<compile_context>
chip_gen: v6e
topology: v6e:2x2x1
jax: 0.10.0
libtpu: 0.0.40
codegen_flags: <defaults>
</compile_context>

<pallas_src>
import itertools
import math
from functools import partial

import jax
import jax.numpy as jnp
from jax.experimental import pallas as pl
from jax.experimental.pallas import tpu as pltpu


# ----------------------------------------------------------------------------
# Static monomial structure (KoopmanTensor order-`order` observables).
# ----------------------------------------------------------------------------
def monomial_terms(state_dim: int, order: int = 2):
    """Tuple of feature-index tuples; entry k lists the features multiplied in
    monomial k (empty tuple = constant).  Ordering matches KoopmanTensor phi:
    grouped by total degree, combinations_with_replacement within a degree."""
    terms = []
    for total in range(order + 1):
        for combo in itertools.combinations_with_replacement(range(state_dim), total):
            terms.append(tuple(combo))
    return tuple(terms)


def monomial_exponents(state_dim: int, order: int = 2) -> jnp.ndarray:
    """Exponent matrix (phi_dim, state_dim) -- used only by the JAX reference."""
    e = [[t.count(j) for j in range(state_dim)] for t in monomial_terms(state_dim, order)]
    return jnp.asarray(e, dtype=jnp.float32)


# ----------------------------------------------------------------------------
# Kernels
# ----------------------------------------------------------------------------
def _koopman_v_kernel_order2(x_ref, w_ref, o_ref, *, d, const_idx, lin_idx, quad_idx):
    """Horner-factored order-2 evaluation, batched over (sublane, lane).

    x_ref: (D, TB_sub, 128)  VMEM  -- features on leading (untiled) axis
    w_ref: (P,)              SMEM  -- Linear(phi_dim, 1, bias=False) weights
    o_ref: (TB_sub, 128)     VMEM  -- V(x) per batch element (lane-dense)
    """
    xs = [x_ref[j] for j in range(d)]          # dense (TB_sub, 128) tiles
    acc = w_ref[const_idx]                     # scalar SMEM read (w0)
    for j in range(d):
        inner = w_ref[lin_idx[j]]              # linear weight for x_j
        for i in range(j, d):                  # quadratic weights w_{j,i}
            inner = inner + w_ref[quad_idx[(j, i)]] * xs[i]
        acc = acc + xs[j] * inner
    o_ref[...] = acc


def _koopman_v_kernel_generic(x_ref, w_ref, o_ref, *, d, terms):
    """Direct product-sum for arbitrary monomial order (fallback path)."""
    xs = [x_ref[j] for j in range(d)]
    acc = None
    const_w = None
    for k, feats in enumerate(terms):
        if not feats:
            const_w = w_ref[k]
            continue
        prod = xs[feats[0]]
        for j in feats[1:]:
            prod = prod * xs[j]
        contrib = w_ref[k] * prod
        acc = contrib if acc is None else acc + contrib
    if const_w is not None:
        acc = const_w if acc is None else acc + const_w
    o_ref[...] = jnp.broadcast_to(acc, o_ref.shape).astype(jnp.float32)


# ----------------------------------------------------------------------------
# Tiling policy
# ----------------------------------------------------------------------------
def _choose_tile_sub(n_rows: int, d: int, target_sub: int = 2048) -> int:
    """Pick the sublane tile (rows of 128 lanes):
       * multi-MB blocks so the ~0.35 us per-step overhead is amortized,
       * double-buffered (in + out) footprint capped ~12 MiB (safe on v5e's
         16 MiB scoped default; far under v6e/v7x defaults),
       * >= 2 grid steps when enough data exists (v7x has 2 TensorCores)."""
    if n_rows <= 8:
        return n_rows                              # single full-extent block
    vmem_budget = 12 * 1024 * 1024                 # bytes, double-buffered
    cap = vmem_budget // (2 * (d + 1) * 128 * 4)
    cap = max(8, (cap // 8) * 8)
    tb = max(8, min(target_sub, cap, (n_rows // 8) * 8))
    if pl.cdiv(n_rows, tb) < 2:
        tb = max(8, (pl.cdiv(n_rows, 2) // 8) * 8)
    return tb


# ----------------------------------------------------------------------------
# Forward wrapper
# ----------------------------------------------------------------------------
def soft_koopman_v_forward(state, weight, *, order: int = 2,
                           target_sub_tile: int = 2048,
                           state_is_transposed: bool = False):
    """state: (B, D) f32 (or (D, B) if state_is_transposed), weight: (P, 1) f32
    -> (B, 1) f32 with P = C(D+order, order)."""
    if state_is_transposed:
        x = state.astype(jnp.float32)              # already the module's state.T
        d, b = x.shape
    else:
        b, d = state.shape
        x = state.astype(jnp.float32).T            # the module forms state.T anyway

    terms = monomial_terms(d, order)
    p = len(terms)
    assert weight.shape == (p, 1), (weight.shape, p)

    lane = 128
    n_rows = pl.cdiv(b, lane)
    tb = _choose_tile_sub(n_rows, d, target_sub_tile)
    grid = pl.cdiv(n_rows, tb)
    n_rows_pad = grid * tb
    b_pad = n_rows_pad * lane

    if b_pad != b:                                 # fusable pad, no zero+scatter
        x = jnp.pad(x, ((0, 0), (0, b_pad - b)))
    x = x.reshape(d, n_rows_pad, lane)             # batch on (sublane, lane)

    w = weight.astype(jnp.float32).reshape(p)

    if order == 2:
        const_idx = terms.index(())
        lin_idx = {t[0]: k for k, t in enumerate(terms) if len(t) == 1}
        quad_idx = {t: k for k, t in enumerate(terms) if len(t) == 2}
        kernel = partial(_koopman_v_kernel_order2, d=d, const_idx=const_idx,
                         lin_idx=lin_idx, quad_idx=quad_idx)
    else:
        kernel = partial(_koopman_v_kernel_generic, d=d, terms=terms)

    out = pl.pallas_call(
        kernel,
        out_shape=jax.ShapeDtypeStruct((n_rows_pad, lane), jnp.float32),
        grid=(grid,),
        in_specs=[
            pl.BlockSpec((d, tb, lane), lambda i: (0, i, 0)),
            pl.BlockSpec(memory_space=pltpu.MemorySpace.SMEM),   # whole weight vec
        ],
        out_specs=pl.BlockSpec((tb, lane), lambda i: (i, 0)),
        compiler_params=pltpu.CompilerParams(
            dimension_semantics=("parallel",)),
    )(x, w)

    # Layout plumbing back to the PyTorch (B, 1) shape (outside the kernel).
    return out.reshape(-1)[:b].reshape(b, 1)


# ----------------------------------------------------------------------------
# Pure-JAX reference (independent path; handles any monomial order)
# ----------------------------------------------------------------------------
def reference_forward(state, weight, *, order: int = 2):
    e = monomial_exponents(state.shape[1], order)            # (P, D)
    phi = jnp.prod(state[:, None, :].astype(jnp.float32) ** e[None, :, :], axis=-1)
    return phi @ weight.astype(jnp.float32)                  # (B, 1)


if __name__ == "__main__":
    key = jax.random.PRNGKey(0)
    k_state, k_w, k_state2 = jax.random.split(key, 3)

    state_dim = 4
    order = 2
    phi_dim = len(monomial_terms(state_dim, order))   # C(4+2, 2) = 15

    # nn.Linear(phi_dim, 1, bias=False): weight ~ U(-1/sqrt(phi_dim), 1/sqrt(phi_dim))
    bound = 1.0 / math.sqrt(phi_dim)
    weight = jax.random.uniform(k_w, (phi_dim, 1), jnp.float32, -bound, bound)

    # Case 1: batch not a multiple of 128 -> exercises padding, single-block grid.
    batch = 300
    state = jax.random.normal(k_state, (batch, state_dim), jnp.float32)
    out = jax.block_until_ready(soft_koopman_v_forward(state, weight, order=order))
    ref = reference_forward(state, weight, order=order)
    assert out.shape == (batch, 1), out.shape
    assert jnp.allclose(out, ref, atol=1e-5, rtol=1e-5)

    # Case 2: larger batch -> exercises multi-block grid + row padding.
    batch2 = 1200
    state2 = jax.random.normal(k_state2, (batch2, state_dim), jnp.float32)
    out2 = jax.block_until_ready(soft_koopman_v_forward(state2, weight, order=order))
    ref2 = reference_forward(state2, weight, order=order)
    assert out2.shape == (batch2, 1), out2.shape
    assert jnp.allclose(out2, ref2, atol=1e-5, rtol=1e-5)

    print("KERNEL_OK")
</pallas_src>

<mosaic_0001>
module attributes {stable_mosaic.version = 11 : i64} {
  func.func @_koopman_v_kernel_order2(%arg0: i32, %arg1: memref<4x3x128xf32, #tpu.memory_space<vmem>>, %arg2: memref<15xf32, #tpu.memory_space<smem>>, %arg3: memref<3x128xf32, #tpu.memory_space<vmem>>) attributes {dimension_semantics = [#tpu.dimension_semantics<parallel>], iteration_bounds = array<i64: 1>, scalar_prefetch = 0 : i64, scratch_operands = 0 : i64, tpu.core_type = #tpu.core_type<tc>, window_params = [{transform_indices = @transform_0, window_bounds = array<i64: 4, 3, 128>}, {transform_indices = @transform_1, window_bounds = array<i64: 15>}, {transform_indices = @transform_2, window_bounds = array<i64: 3, 128>}]} {
    %c0 = arith.constant 0 : index
    %c0_0 = arith.constant 0 : index
    %c0_1 = arith.constant 0 : index
    %0 = vector.load %arg1[%c0, %c0_0, %c0_1] : memref<4x3x128xf32, #tpu.memory_space<vmem>>, vector<1x3x128xf32>
    %1 = vector.shape_cast %0 : vector<1x3x128xf32> to vector<3x128xf32>
    %c1 = arith.constant 1 : index
    %c0_2 = arith.constant 0 : index
    %c0_3 = arith.constant 0 : index
    %2 = vector.load %arg1[%c1, %c0_2, %c0_3] : memref<4x3x128xf32, #tpu.memory_space<vmem>>, vector<1x3x128xf32>
    %3 = vector.shape_cast %2 : vector<1x3x128xf32> to vector<3x128xf32>
    %c2 = arith.constant 2 : index
    %c0_4 = arith.constant 0 : index
    %c0_5 = arith.constant 0 : index
    %4 = vector.load %arg1[%c2, %c0_4, %c0_5] : memref<4x3x128xf32, #tpu.memory_space<vmem>>, vector<1x3x128xf32>
    %5 = vector.shape_cast %4 : vector<1x3x128xf32> to vector<3x128xf32>
    %c3 = arith.constant 3 : index
    %c0_6 = arith.constant 0 : index
    %c0_7 = arith.constant 0 : index
    %6 = vector.load %arg1[%c3, %c0_6, %c0_7] : memref<4x3x128xf32, #tpu.memory_space<vmem>>, vector<1x3x128xf32>
    %7 = vector.shape_cast %6 : vector<1x3x128xf32> to vector<3x128xf32>
    %c0_8 = arith.constant 0 : index
    %8 = memref.load %arg2[%c0_8] : memref<15xf32, #tpu.memory_space<smem>>
    %c1_9 = arith.constant 1 : index
    %9 = memref.load %arg2[%c1_9] : memref<15xf32, #tpu.memory_space<smem>>
    %c5 = arith.constant 5 : index
    %10 = memref.load %arg2[%c5] : memref<15xf32, #tpu.memory_space<smem>>
    %11 = vector.broadcast %10 : f32 to vector<3x128xf32>
    %12 = arith.mulf %11, %1 : vector<3x128xf32>
    %13 = vector.broadcast %9 : f32 to vector<3x128xf32>
    %14 = arith.addf %13, %12 : vector<3x128xf32>
    %c6 = arith.constant 6 : index
    %15 = memref.load %arg2[%c6] : memref<15xf32, #tpu.memory_space<smem>>
    %16 = vector.broadcast %15 : f32 to vector<3x128xf32>
    %17 = arith.mulf %16, %3 : vector<3x128xf32>
    %18 = arith.addf %14, %17 : vector<3x128xf32>
    %c7 = arith.constant 7 : index
    %19 = memref.load %arg2[%c7] : memref<15xf32, #tpu.memory_space<smem>>
    %20 = vector.broadcast %19 : f32 to vector<3x128xf32>
    %21 = arith.mulf %20, %5 : vector<3x128xf32>
    %22 = arith.addf %18, %21 : vector<3x128xf32>
    %c8 = arith.constant 8 : index
    %23 = memref.load %arg2[%c8] : memref<15xf32, #tpu.memory_space<smem>>
    %24 = vector.broadcast %23 : f32 to vector<3x128xf32>
    %25 = arith.mulf %24, %7 : vector<3x128xf32>
    %26 = arith.addf %22, %25 : vector<3x128xf32>
    %27 = arith.mulf %1, %26 : vector<3x128xf32>
    %28 = vector.broadcast %8 : f32 to vector<3x128xf32>
    %29 = arith.addf %28, %27 : vector<3x128xf32>
    %c2_10 = arith.constant 2 : index
    %30 = memref.load %arg2[%c2_10] : memref<15xf32, #tpu.memory_space<smem>>
    %c9 = arith.constant 9 : index
    %31 = memref.load %arg2[%c9] : memref<15xf32, #tpu.memory_space<smem>>
    %32 = vector.broadcast %31 : f32 to vector<3x128xf32>
    %33 = arith.mulf %32, %3 : vector<3x128xf32>
    %34 = vector.broadcast %30 : f32 to vector<3x128xf32>
    %35 = arith.addf %34, %33 : vector<3x128xf32>
    %c10 = arith.constant 10 : index
    %36 = memref.load %arg2[%c10] : memref<15xf32, #tpu.memory_space<smem>>
    %37 = vector.broadcast %36 : f32 to vector<3x128xf32>
    %38 = arith.mulf %37, %5 : vector<3x128xf32>
    %39 = arith.addf %35, %38 : vector<3x128xf32>
    %c11 = arith.constant 11 : index
    %40 = memref.load %arg2[%c11] : memref<15xf32, #tpu.memory_space<smem>>
    %41 = vector.broadcast %40 : f32 to vector<3x128xf32>
    %42 = arith.mulf %41, %7 : vector<3x128xf32>
    %43 = arith.addf %39, %42 : vector<3x128xf32>
    %44 = arith.mulf %3, %43 : vector<3x128xf32>
    %45 = arith.addf %29, %44 : vector<3x128xf32>
    %c3_11 = arith.constant 3 : index
    %46 = memref.load %arg2[%c3_11] : memref<15xf32, #tpu.memory_space<smem>>
    %c12 = arith.constant 12 : index
    %47 = memref.load %arg2[%c12] : memref<15xf32, #tpu.memory_space<smem>>
    %48 = vector.broadcast %47 : f32 to vector<3x128xf32>
    %49 = arith.mulf %48, %5 : vector<3x128xf32>
    %50 = vector.broadcast %46 : f32 to vector<3x128xf32>
    %51 = arith.addf %50, %49 : vector<3x128xf32>
    %c13 = arith.constant 13 : index
    %52 = memref.load %arg2[%c13] : memref<15xf32, #tpu.memory_space<smem>>
    %53 = vector.broadcast %52 : f32 to vector<3x128xf32>
    %54 = arith.mulf %53, %7 : vector<3x128xf32>
    %55 = arith.addf %51, %54 : vector<3x128xf32>
    %56 = arith.mulf %5, %55 : vector<3x128xf32>
    %57 = arith.addf %45, %56 : vector<3x128xf32>
    %c4 = arith.constant 4 : index
    %58 = memref.load %arg2[%c4] : memref<15xf32, #tpu.memory_space<smem>>
    %c14 = arith.constant 14 : index
    %59 = memref.load %arg2[%c14] : memref<15xf32, #tpu.memory_space<smem>>
    %60 = vector.broadcast %59 : f32 to vector<3x128xf32>
    %61 = arith.mulf %60, %7 : vector<3x128xf32>
    %62 = vector.broadcast %58 : f32 to vector<3x128xf32>
    %63 = arith.addf %62, %61 : vector<3x128xf32>
    %64 = arith.mulf %7, %63 : vector<3x128xf32>
    %65 = arith.addf %57, %64 : vector<3x128xf32>
    %c0_12 = arith.constant 0 : index
    %c0_13 = arith.constant 0 : index
    %66 = vector.load %arg3[%c0_12, %c0_13] : memref<3x128xf32, #tpu.memory_space<vmem>>, vector<3x128xf32>
    tpu.vector_store %arg3[%c0_12, %c0_13], %65 {strides = array<i32>} : memref<3x128xf32, #tpu.memory_space<vmem>>, vector<3x128xf32>,
    return
  }
  func.func @transform_0(%arg0: i32) -> (i32, i32, i32) {
    %c0_i32 = arith.constant 0 : i32
    %c0_i32_0 = arith.constant 0 : i32
    %c0_i32_1 = arith.constant 0 : i32
    return %c0_i32, %arg0, %c0_i32_0 : i32, i32, i32
  }
  func.func @transform_1(%arg0: i32) -> i32 {
    %c0_i32 = arith.constant 0 : i32
    %c0_i32_0 = arith.constant 0 : i32
    return %c0_i32 : i32
  }
  func.func @transform_2(%arg0: i32) -> (i32, i32) {
    %c0_i32 = arith.constant 0 : i32
    %c0_i32_0 = arith.constant 0 : i32
    return %arg0, %c0_i32 : i32, i32
  }
}

</mosaic_0001>

<bundles_post_ra>
// kernel: tpu_custom_call.1
= control target key start
LH: loop header
LB: loop body
LE: loop exit
PB: predicated region body
PF: predicated region fallthrough
CT: control target
= control target key end

     0   :  { %7 = vsyncpa [#allocation4], 0  ;;  %s202_s0 = inlined_call_operand.vmem [shape: f32[4,3,128], index: 0, kind: input, shape index: {}]   ;;  %s203_s1 = inlined_call_operand.vmem [shape: f32[15], index: 1, kind: input, shape index: {}]   ;;  %s204_s2 = inlined_call_operand.hbm [shape: f32[3,128], index: 2, kind: output, shape index: {}]  }
   0x1   :  { %8 = vsyncpa [#allocation3], 0  ;;  %s17_s11 = sshll.u32 %s203_s1, 4  ;;  %s18_s11 = int_to_ptr.vmem [resolvable:$true] %s17_s11 }
   0x2   :  { %s125_s12 = scalar_lea.vmem %s18_s11, 16  ;;  %p130_p1 = scmp.lt.s32.totalorder %s18_s11, %s18_s11 }
   0x3   :  { %p126_p0 = scmp.ne.s32.totalorder %s18_s11, %s125_s12  ;;  %p131_p2 = scmp.lt.s32.totalorder %s125_s12, %s125_s12 }
   0x5   :  { %p132_p3 = por %p131_p2, %p130_p1 }
   0x7   :  { %p133_p4 = pnand %p132_p3, %p126_p0 }
   0x9   :  { %136 = shalt.err (!%p133_p4)
}
   0xa   :  { %s161_s13 = smov [#allocation2]  }
   0xb   :  { %20 = dma.vmem_to_smem %s18_s11, 16, %s161_s13, [#allocation4]  }
   0xc   :  { %157 = dma.done.wait [#allocation4], 16  }
   0xd   :  { %158 = vsyncadd [#allocation4], 4294967280 }
   0xe   :  { %24 = sfence }
   0xf   :  { %s181_s14 = sld [smem:[#allocation2]]  ;;  %v25_v0 = vld [vmem:[%s202_s0] sm:$0x7]  ;;  %v106_v1 = vld [vmem:[%s202_s0 + $0x4] sm:$0x7] }
  0x10   :  { %s109_s15 = sld [smem:[#allocation2 + $0x1]]  ;;  %v107_v2 = vld [vmem:[%s202_s0 + $0x8] sm:$0x7]  ;;  %v108_v7 = vld [vmem:[%s202_s0 + $0xc] sm:$0x7]  ;;  %s162_s0 = smov [#allocation5]  }
  0x11   :  { %s110_s16 = sld [smem:[#allocation2 + $0x5]]  ;;  %s97_s8 = sshll.u32 %s162_s0, 4  ;;  %s98_s8 = int_to_ptr.vmem [resolvable:$true] %s97_s8 }
  0x12   :  { %s111_s17 = sld [smem:[#allocation2 + $0x6]]  ;;  %s137_s9 = scalar_lea.vmem %s98_s8, 64 }
  0x13   :  { %s112_s18 = sld [smem:[#allocation2 + $0x7]]  ;;  %p138_p5 = scmp.ne.s32.totalorder %s98_s8, %s137_s9 }
  0x14   :  { %s113_s1 = sld [smem:[#allocation2 + $0x8]]  ;;  %p142_p6 = scmp.lt.s32.totalorder %s98_s8, %s98_s8 }
  0x15   :  { %s186_s21 = sld [smem:[#allocation2 + $0x2]]  ;;  %v52_v27 = vstv %s181_s14  ;;  %p143_p7 = scmp.lt.s32.totalorder %s137_s9, %s137_s9 }
  0x16   :  { %s115_s24 = sld [smem:[#allocation2 + $0x9]]  ;;  %v37_v4 = vstv %s109_s15 }
  0x17   :  { %v35_v3 = vstv %s110_s16  ;;  %s116_s27 = sld [smem:[#allocation2 + $0xa]]  ;;  %p144_p8 = por %p143_p7, %p142_p6 }
  0x18   :  { %v36_v5 = vmul.f32 %v35_v3, %v25_v0  ;;  %v40_v6 = vstv %s111_s17  ;;  %s117_s28 = sld [smem:[#allocation2 + $0xb]] }
  0x19   :  { %v41_v8 = vmul.f32 %v106_v1, %v40_v6  ;;  %v44_v9 = vstv %s112_s18  ;;  %s118_s3 = sld [smem:[#allocation2 + $0x3]]  ;;  %p145_p9 = pnand %p144_p8, %p138_p5 }
  0x1a   :  { %v38_v10 = vadd.f32 %v37_v4, %v36_v5  ;;  %v45_v11 = vmul.f32 %v107_v2, %v44_v9  ;;  %v48_v12 = vstv %s113_s1  ;;  %s119_s4 = sld [smem:[#allocation2 + $0xc]] }
  0x1b   :  { %s120_s5 = sld [smem:[#allocation2 + $0xd]]  ;;  %v49_v14 = vmul.f32 %v108_v7, %v48_v12  ;;  %v58_v16 = vstv %s186_s21 }
  0x1c   :  { %v42_v13 = vadd.f32 %v41_v8, %v38_v10  ;;  %v56_v15 = vstv %s115_s24  ;;  %s121_s6 = sld [smem:[#allocation2 + $0x4]] }
  0x1d   :  { %v57_v17 = vmul.f32 %v106_v1, %v56_v15  ;;  %v61_v18 = vstv %s116_s27  ;;  %s122_s7 = sld [smem:[#allocation2 + $0xe]] }
  0x1e   :  { %v46_v19 = vadd.f32 %v45_v11, %v42_v13  ;;  %v62_v20 = vmul.f32 %v107_v2, %v61_v18  ;;  %v65_v21 = vstv %s117_s28 }
  0x1f   :  { %v59_v22 = vadd.f32 %v58_v16, %v57_v17  ;;  %v66_v23 = vmul.f32 %v108_v7, %v65_v21  ;;  %v74_v26 = vstv %s118_s3 }
  0x20   :  { %v50_v24 = vadd.f32 %v49_v14, %v46_v19  ;;  %v72_v25 = vstv %s119_s4 }
  0x21   :  { %v63_v28 = vadd.f32 %v62_v20, %v59_v22  ;;  %v73_v29 = vmul.f32 %v107_v2, %v72_v25  ;;  %v77_v30 = vstv %s120_s5 }
  0x22   :  { %v51_v31 = vmul.f32 %v50_v24, %v25_v0  ;;  %v78_v32 = vmul.f32 %v108_v7, %v77_v30  ;;  %v86_v36 = vstv %s121_s6 }
  0x23   :  { %v67_v33 = vadd.f32 %v66_v23, %v63_v28  ;;  %v75_v34 = vadd.f32 %v74_v26, %v73_v29  ;;  %v84_v35 = vstv %s122_s7 }
  0x24   :  { %v53_v37 = vadd.f32 %v52_v27, %v51_v31  ;;  %v85_v38 = vmul.f32 %v108_v7, %v84_v35 }
  0x25   :  { %v68_v39 = vmul.f32 %v106_v1, %v67_v33  ;;  %v79_v40 = vadd.f32 %v78_v32, %v75_v34 }
  0x26   :  { %v87_v41 = vadd.f32 %v86_v36, %v85_v38 }
  0x27   :  { %v69_v42 = vadd.f32 %v68_v39, %v53_v37  ;;  %v80_v43 = vmul.f32 %v107_v2, %v79_v40 }
  0x28   :  { %v88_v44 = vmul.f32 %v108_v7, %v87_v41 }
  0x29   :  { %v81_v45 = vadd.f32 %v80_v43, %v69_v42 }
  0x2b   :  { %v89_v46 = vadd.f32 %v88_v44, %v81_v45 }
  0x2d   :  { %90 = vst [vmem:[#allocation5] sm:$0x7] %v89_v46 }
  0x2e   :  { %148 = shalt.err (!%p145_p9)
}
  0x2f   :  { %100 = dma.vmem_to_hbm [thread:$0]  %s98_s8, 64, %s204_s2, [#allocation3]  }
  0x30   :  { %159 = dma.done.wait [#allocation3], 64  }
  0x31   :  { %160 = vsyncadd [#allocation3], 4294967232 }
  0x32   :  { %104 = vsyncpa [#allocation3], 1 }
  0x33   :  { %105 = vsyncpa [#allocation4], 1 }

</bundles_post_ra>
